<compile_context>
chip_gen: v7x
topology: tpu7x:2x2x1
jax: 0.10.0
libtpu: 0.0.40
codegen_flags: <defaults>
</compile_context>

<pallas_src>
import functools

import numpy as np
import jax
import jax.numpy as jnp
from jax import lax
from jax.experimental import pallas as pl
from jax.experimental.pallas import tpu as pltpu


# ----------------------------------------------------------------------------
# Schedule construction (pure numpy "__init__" glue, identical to the PyTorch
# reference code).
# ----------------------------------------------------------------------------
def cosine_beta_schedule(timesteps, s=0.008, raise_to_power: float = 1):
    steps = timesteps + 2
    x = np.linspace(0, steps, steps)
    alphas_cumprod = np.cos((x / steps + s) / (1 + s) * np.pi * 0.5) ** 2
    alphas_cumprod = alphas_cumprod / alphas_cumprod[0]
    betas = 1 - alphas_cumprod[1:] / alphas_cumprod[:-1]
    betas = np.clip(betas, a_min=0, a_max=0.999)
    alphas = 1.0 - betas
    alphas_cumprod = np.cumprod(alphas, axis=0)
    if raise_to_power != 1:
        alphas_cumprod = np.power(alphas_cumprod, raise_to_power)
    return alphas_cumprod


def clip_noise_schedule(alphas2, clip_value=0.001):
    alphas2 = np.concatenate([np.ones(1), alphas2], axis=0)
    alphas_step = alphas2[1:] / alphas2[:-1]
    alphas_step = np.clip(alphas_step, a_min=clip_value, a_max=1.0)
    alphas2 = np.cumprod(alphas_step, axis=0)
    return alphas2


def polynomial_schedule(timesteps: int, s=0.0001, power=3.0):
    steps = timesteps + 1
    x = np.linspace(0, steps, steps)
    alphas2 = (1 - np.power(x / steps, power)) ** 2
    alphas2 = clip_noise_schedule(alphas2, clip_value=0.001)
    precision = 1 - 2 * s
    alphas2 = precision * alphas2 + s
    return alphas2


def sigmoid_beta_schedule(beta_start=1e-07, beta_end=0.002,
                          num_diffusion_timesteps=4999):
    steps = num_diffusion_timesteps + 1
    betas = np.linspace(-6, 6, steps)
    betas = 1 / (np.exp(-betas) + 1)
    betas = betas * (beta_end - beta_start) + beta_start
    alphas = 1.0 - betas
    alphas_cumprod = np.cumprod(alphas, axis=0)
    return alphas_cumprod


def build_gamma_table(noise_schedule: str, timesteps: int, precision: float):
    if noise_schedule == 'cosine':
        alphas2 = cosine_beta_schedule(timesteps)
    elif 'polynomial' in noise_schedule:
        splits = noise_schedule.split('_')
        assert len(splits) == 2
        power = float(splits[1])
        alphas2 = polynomial_schedule(timesteps, s=precision, power=power)
    elif noise_schedule == 'sigmoid':
        alphas2 = sigmoid_beta_schedule(beta_start=1e-07, beta_end=0.002,
                                        num_diffusion_timesteps=timesteps)
    else:
        raise ValueError(noise_schedule)
    sigmas2 = 1 - alphas2
    log_alphas2 = np.log(alphas2)
    log_sigmas2 = np.log(sigmas2)
    log_alphas2_to_sigmas2 = log_alphas2 - log_sigmas2
    gamma = (-log_alphas2_to_sigmas2).astype(np.float32)   # shape (timesteps+1,)
    return gamma


def _round_up(x: int, m: int) -> int:
    return ((x + m - 1) // m) * m


# ----------------------------------------------------------------------------
# Kernel 1 (small B): scalar gather from an SMEM-resident table.
#   t_int_ref : SMEM int32 (B,)   -- scalar-prefetch arg, already rounded+clamped
#   gamma_ref : SMEM f32   (T+1,) -- full table (~4 KB), untiled
#   o_ref     : SMEM f32   (B,)
# No vector intermediates: B scalar-unit loads + stores.  Full unroll for
# B <= 64, partial unroll (8) above that so the LLO scheduler can overlap the
# dependent sld(t_int) -> sld(gamma) chains of independent iterations.
# ----------------------------------------------------------------------------
def _gamma_lookup_smem_kernel(t_int_ref, gamma_ref, o_ref):
    B = o_ref.shape[0]

    def body(b, carry):
        o_ref[b] = gamma_ref[t_int_ref[b]]
        return carry

    unroll = True if B <= 64 else 8
    lax.fori_loop(0, B, body, 0, unroll=unroll)


# ----------------------------------------------------------------------------
# Kernel 2 (large B): batch-tiled, lane-dense hi/lo-factored one-hot gather.
#   t_ref     : VMEM f32 (1, B_TILE)   -- batch on the lane axis
#   gamma_ref : VMEM f32 (R, 128)      -- table padded to R*128 entries
#   o_ref     : VMEM f32 (1, B_TILE)   -- lane-dense output
#   lo = idx & 127 ; hi = idx >> 7
#   P   = gamma(R,128) @ onehot_lo(128,B_TILE)   (MXU, K=128)
#   out = sum_h P * (hi == h)                    (sublane reduce, XLU)
# ----------------------------------------------------------------------------
def _gamma_lookup_vec_kernel(t_ref, gamma_ref, o_ref, *, timesteps):
    t = t_ref[...]                                             # (1, B_TILE) f32
    # Clip in float BEFORE the int cast (garbage/NaN lanes of a padded last
    # block must not go through an out-of-range float->int cast), then clamp
    # again as ints (belt and suspenders against NaN cast results).
    tf = jnp.clip(t * jnp.float32(timesteps), 0.0, jnp.float32(timesteps))
    t_int = jnp.round(tf).astype(jnp.int32)                    # (1, B_TILE)
    t_int = jnp.clip(t_int, 0, timesteps)

    lo = jnp.bitwise_and(t_int, 127)                           # lane index
    hi = lax.shift_right_logical(t_int, 7)                     # row index

    R = gamma_ref.shape[0]
    B_tile = t.shape[1]

    lane = lax.broadcasted_iota(jnp.int32, (128, B_tile), 0)   # (128, B_TILE)
    onehot_lo = (lane == lo).astype(jnp.float32)               # (128, B_TILE)

    # (R, 128) @ (128, B_TILE) -> (R, B_TILE) on the MXU.
    p = jnp.dot(gamma_ref[...], onehot_lo,
                preferred_element_type=jnp.float32)

    row = lax.broadcasted_iota(jnp.int32, (R, B_tile), 0)      # (R, B_TILE)
    sel = jnp.where(row == hi, p, jnp.float32(0.0))
    o_ref[...] = jnp.sum(sel, axis=0, keepdims=True)           # (1, B_TILE)


class PredefinedNoiseSchedule:
    """JAX/Pallas port of the PyTorch PredefinedNoiseSchedule module."""

    # Batches at or below this size use the SMEM scalar-gather path.
    _SCALAR_PATH_MAX_B = 256
    # Max batch tile for the vectorized path (multiple of 128, lane-dense).
    _B_TILE_MAX = 2048

    def __init__(self, noise_schedule: str, timesteps: int, precision: float):
        self.timesteps = timesteps
        gamma = build_gamma_table(noise_schedule, timesteps, precision)
        T1 = gamma.shape[0]                               # timesteps + 1

        # 1-D table for the SMEM scalar path (and pure-JAX reference).
        self.gamma_1d = jnp.asarray(gamma)                # (T1,) f32

        # Lane-padded table reshaped to (R, 128) for the hi/lo vector path.
        # Pad with the edge value; the clamp in the kernel guarantees padded
        # entries are never selected.
        T_pad = _round_up(T1, 128)
        self._rows = T_pad // 128
        gamma_pad = np.pad(gamma, (0, T_pad - T1), mode='edge')
        self.gamma_2d = jnp.asarray(gamma_pad).reshape(self._rows, 128)

    # -- small-B path: scalar prefetch + SMEM table ---------------------------
    def _forward_scalar(self, t_flat):
        B = t_flat.shape[0]
        t_int = jnp.clip(
            jnp.round(t_flat.astype(jnp.float32) * jnp.float32(self.timesteps)),
            0, self.timesteps).astype(jnp.int32)          # (B,) int32

        out = pl.pallas_call(
            _gamma_lookup_smem_kernel,
            out_shape=jax.ShapeDtypeStruct((B,), jnp.float32),
            grid_spec=pltpu.PrefetchScalarGridSpec(
                num_scalar_prefetch=1,                    # t_int -> SMEM
                grid=(1,),
                in_specs=[
                    pl.BlockSpec(memory_space=pltpu.MemorySpace.SMEM),  # gamma
                ],
                out_specs=pl.BlockSpec(memory_space=pltpu.MemorySpace.SMEM),
            ),
            compiler_params=pltpu.CompilerParams(
                dimension_semantics=("arbitrary",)),
        )(t_int, self.gamma_1d)
        return out                                        # (B,) f32

    # -- large-B path: batch-tiled lane-dense hi/lo one-hot matmul ------------
    def _pick_b_tile(self, B: int) -> int:
        # Big enough to amortize the ~600-cycle per-grid-step overhead and get
        # wide unmasked stores, capped at 2048 lanes, and <= ~half the batch so
        # the "parallel" grid axis has >= 2 steps (megacore split on dual-TC
        # generations).  VMEM footprint stays tiny everywhere:
        # onehot_lo is 128 * B_TILE * 4 B <= 1 MiB.
        half = _round_up(pl.cdiv(B, 2), 128)
        return max(128, min(self._B_TILE_MAX, half))

    def _forward_vectorized(self, t_flat):
        B = t_flat.shape[0]
        B_TILE = self._pick_b_tile(B)
        R = self._rows

        kernel = functools.partial(_gamma_lookup_vec_kernel,
                                   timesteps=self.timesteps)

        out = pl.pallas_call(
            kernel,
            out_shape=jax.ShapeDtypeStruct((1, B), jnp.float32),
            grid_spec=pltpu.PrefetchScalarGridSpec(
                num_scalar_prefetch=0,
                grid=(pl.cdiv(B, B_TILE),),
                in_specs=[
                    pl.BlockSpec((1, B_TILE), lambda i: (0, i)),   # t (lane-dense)
                    pl.BlockSpec((R, 128), lambda i: (0, 0)),      # gamma table
                ],
                out_specs=pl.BlockSpec((1, B_TILE), lambda i: (0, i)),
            ),
            compiler_params=pltpu.CompilerParams(
                dimension_semantics=("parallel",)),       # megacore on dual-TC
        )(t_flat.reshape(1, B).astype(jnp.float32), self.gamma_2d)
        return out.reshape(B)                             # (B,) f32

    def __call__(self, t: jnp.ndarray) -> jnp.ndarray:
        """t: float array of normalized timesteps in [0, 1]; any shape.
        Returns gamma[round(t * timesteps)] with the same shape as t."""
        t = jnp.asarray(t, dtype=jnp.float32)
        orig_shape = t.shape
        t_flat = t.reshape(-1)
        B = t_flat.shape[0]
        if B <= self._SCALAR_PATH_MAX_B:
            out = self._forward_scalar(t_flat)
        else:
            out = self._forward_vectorized(t_flat)
        return out.reshape(orig_shape)


if __name__ == "__main__":
    timesteps = 1000
    sched = PredefinedNoiseSchedule("polynomial_2", timesteps=timesteps,
                                    precision=1e-5)

    key = jax.random.PRNGKey(0)
    k_small, k_big = jax.random.split(key)

    # --- small batch: SMEM scalar-gather path (the common case) -------------
    B_small = 8
    t_small = jax.random.uniform(k_small, (B_small, 1), dtype=jnp.float32)
    out_small = jax.block_until_ready(sched(t_small))

    t_int_small = jnp.clip(jnp.round(t_small * timesteps), 0,
                           timesteps).astype(jnp.int32)[:, 0]
    ref_small = sched.gamma_1d[t_int_small][:, None]
    assert out_small.shape == (B_small, 1)
    assert jnp.allclose(out_small, ref_small, atol=1e-6), (out_small, ref_small)

    # --- moderate batch: vectorized hi/lo MXU path (grid=2, partial block) ---
    B_big = 640
    t_big = jax.random.uniform(k_big, (B_big,), dtype=jnp.float32)
    out_big = jax.block_until_ready(sched(t_big))

    t_int_big = jnp.clip(jnp.round(t_big * timesteps), 0,
                         timesteps).astype(jnp.int32)
    ref_big = sched.gamma_1d[t_int_big]
    assert out_big.shape == (B_big,)
    assert jnp.allclose(out_big, ref_big, atol=1e-6), (out_big, ref_big)

    print("KERNEL_OK")
</pallas_src>

<mosaic_0001>
module attributes {stable_mosaic.version = 11 : i64} {
  func.func @_gamma_lookup_smem_kernel(%arg0: i32, %arg1: memref<8xi32, #tpu.memory_space<smem>>, %arg2: memref<1001xf32, #tpu.memory_space<smem>>, %arg3: memref<8xf32, #tpu.memory_space<smem>>) attributes {dimension_semantics = [#tpu.dimension_semantics<arbitrary>], iteration_bounds = array<i64: 1>, scalar_prefetch = 1 : i64, scratch_operands = 0 : i64, tpu.core_type = #tpu.core_type<tc>, window_params = [{transform_indices = @transform_0, window_bounds = array<i64: 1001>}, {transform_indices = @transform_1, window_bounds = array<i64: 8>}]} {
    %c0_i32 = arith.constant 0 : i32
    %0 = arith.index_cast %c0_i32 : i32 to index
    %1 = memref.load %arg1[%0] : memref<8xi32, #tpu.memory_space<smem>>
    %2 = arith.index_cast %1 : i32 to index
    %3 = memref.load %arg2[%2] : memref<1001xf32, #tpu.memory_space<smem>>
    %4 = arith.index_cast %c0_i32 : i32 to index
    %5 = memref.load %arg3[%4] : memref<8xf32, #tpu.memory_space<smem>>
    memref.store %3, %arg3[%4] : memref<8xf32, #tpu.memory_space<smem>>
    %c1_i32 = arith.constant 1 : i32
    %6 = arith.index_cast %c1_i32 : i32 to index
    %7 = memref.load %arg1[%6] : memref<8xi32, #tpu.memory_space<smem>>
    %8 = arith.index_cast %7 : i32 to index
    %9 = memref.load %arg2[%8] : memref<1001xf32, #tpu.memory_space<smem>>
    %10 = arith.index_cast %c1_i32 : i32 to index
    %11 = memref.load %arg3[%10] : memref<8xf32, #tpu.memory_space<smem>>
    memref.store %9, %arg3[%10] : memref<8xf32, #tpu.memory_space<smem>>
    %c2_i32 = arith.constant 2 : i32
    %12 = arith.index_cast %c2_i32 : i32 to index
    %13 = memref.load %arg1[%12] : memref<8xi32, #tpu.memory_space<smem>>
    %14 = arith.index_cast %13 : i32 to index
    %15 = memref.load %arg2[%14] : memref<1001xf32, #tpu.memory_space<smem>>
    %16 = arith.index_cast %c2_i32 : i32 to index
    %17 = memref.load %arg3[%16] : memref<8xf32, #tpu.memory_space<smem>>
    memref.store %15, %arg3[%16] : memref<8xf32, #tpu.memory_space<smem>>
    %c3_i32 = arith.constant 3 : i32
    %18 = arith.index_cast %c3_i32 : i32 to index
    %19 = memref.load %arg1[%18] : memref<8xi32, #tpu.memory_space<smem>>
    %20 = arith.index_cast %19 : i32 to index
    %21 = memref.load %arg2[%20] : memref<1001xf32, #tpu.memory_space<smem>>
    %22 = arith.index_cast %c3_i32 : i32 to index
    %23 = memref.load %arg3[%22] : memref<8xf32, #tpu.memory_space<smem>>
    memref.store %21, %arg3[%22] : memref<8xf32, #tpu.memory_space<smem>>
    %c4_i32 = arith.constant 4 : i32
    %24 = arith.index_cast %c4_i32 : i32 to index
    %25 = memref.load %arg1[%24] : memref<8xi32, #tpu.memory_space<smem>>
    %26 = arith.index_cast %25 : i32 to index
    %27 = memref.load %arg2[%26] : memref<1001xf32, #tpu.memory_space<smem>>
    %28 = arith.index_cast %c4_i32 : i32 to index
    %29 = memref.load %arg3[%28] : memref<8xf32, #tpu.memory_space<smem>>
    memref.store %27, %arg3[%28] : memref<8xf32, #tpu.memory_space<smem>>
    %c5_i32 = arith.constant 5 : i32
    %30 = arith.index_cast %c5_i32 : i32 to index
    %31 = memref.load %arg1[%30] : memref<8xi32, #tpu.memory_space<smem>>
    %32 = arith.index_cast %31 : i32 to index
    %33 = memref.load %arg2[%32] : memref<1001xf32, #tpu.memory_space<smem>>
    %34 = arith.index_cast %c5_i32 : i32 to index
    %35 = memref.load %arg3[%34] : memref<8xf32, #tpu.memory_space<smem>>
    memref.store %33, %arg3[%34] : memref<8xf32, #tpu.memory_space<smem>>
    %c6_i32 = arith.constant 6 : i32
    %36 = arith.index_cast %c6_i32 : i32 to index
    %37 = memref.load %arg1[%36] : memref<8xi32, #tpu.memory_space<smem>>
    %38 = arith.index_cast %37 : i32 to index
    %39 = memref.load %arg2[%38] : memref<1001xf32, #tpu.memory_space<smem>>
    %40 = arith.index_cast %c6_i32 : i32 to index
    %41 = memref.load %arg3[%40] : memref<8xf32, #tpu.memory_space<smem>>
    memref.store %39, %arg3[%40] : memref<8xf32, #tpu.memory_space<smem>>
    %c7_i32 = arith.constant 7 : i32
    %42 = arith.index_cast %c7_i32 : i32 to index
    %43 = memref.load %arg1[%42] : memref<8xi32, #tpu.memory_space<smem>>
    %44 = arith.index_cast %43 : i32 to index
    %45 = memref.load %arg2[%44] : memref<1001xf32, #tpu.memory_space<smem>>
    %46 = arith.index_cast %c7_i32 : i32 to index
    %47 = memref.load %arg3[%46] : memref<8xf32, #tpu.memory_space<smem>>
    memref.store %45, %arg3[%46] : memref<8xf32, #tpu.memory_space<smem>>
    %c8_i32 = arith.constant 8 : i32
    return
  }
  func.func @transform_0(%arg0: i32, %arg1: memref<8xi32, #tpu.memory_space<smem>>) -> i32 {
    %c0_i32 = arith.constant 0 : i32
    %c0_i32_0 = arith.constant 0 : i32
    return %c0_i32 : i32
  }
  func.func @transform_1(%arg0: i32, %arg1: memref<8xi32, #tpu.memory_space<smem>>) -> i32 {
    %c0_i32 = arith.constant 0 : i32
    %c0_i32_0 = arith.constant 0 : i32
    return %c0_i32 : i32
  }
}

</mosaic_0001>

<bundles_post_ra>
// kernel: tpu_custom_call.1
= control target key start
LH: loop header
LB: loop body
LE: loop exit
PB: predicated region body
PF: predicated region fallthrough
CT: control target
= control target key end

     0   :  { %s171_s0 = inlined_call_operand.hbm [shape: s32[8], index: 0, kind: input, shape index: {}]   ;;  %s172_s1 = inlined_call_operand.hbm [shape: f32[1001], index: 1, kind: input, shape index: {}]   ;;  %s173_s2 = inlined_call_operand.hbm [shape: f32[8], index: 2, kind: output, shape index: {}]  }
   0x1   :  { %s81_s11 = scalar_lea.hbm %s171_s0, 16 }
   0x2   :  { %p82_p0 = scmp.ne.s32.totalorder %s171_s0, %s81_s11  ;;  %p85_p1 = scmp.lt.u32.totalorder %s81_s11, %s171_s0 }
   0x4   :  { %p87_p2 = pnand %p85_p1, %p82_p0 }
   0x6   :  { %90 = shalt.err (!%p87_p2)  }
   0x7   :  { %s117_s16 = smov [#allocation3]  }
   0x8   :  { %8 = dma.hbm_to_smem %s171_s0, 16, %s117_s16, [#allocation2] }
   0x9   :  { %111 = dma.done.wait [#allocation2], 16 }
   0xa   :  { %112 = vsyncadd [#allocation2], 4294967280 }
   0xb   :  { %10 = sfence }
   0xc   :  { %11 = vsyncpa [#allocation5], 0 }
   0xd   :  { %12 = vsyncpa [#allocation6], 0  ;;  %s91_s21 = scalar_lea.hbm %s172_s1, 128 }
   0xe   :  { %p92_p3 = scmp.ne.s32.totalorder %s172_s1, %s91_s21  ;;  %p95_p4 = scmp.lt.u32.totalorder %s91_s21, %s172_s1 }
  0x10   :  { %p97_p5 = pnand %p95_p4, %p92_p3 }
  0x12   :  { %100 = shalt.err (!%p97_p5)
}
  0x13   :  { %s118_s0 = smov [#allocation4]  }
  0x14   :  { %20 = dma.hbm_to_smem %s172_s1, 128, %s118_s0, [#allocation5]  }
  0x15   :  { %113 = dma.done.wait [#allocation5], 128  }
  0x16   :  { %114 = vsyncadd [#allocation5], 4294967168 }
  0x17   :  { %24 = sfence }
  0x18   :  { %s25_s28 = sld [smem:[#allocation3]]  ;;  %s71_s29 = sld [smem:[#allocation3 + $0x1]] }
  0x19   :  { %s72_s30 = sld [smem:[#allocation3 + $0x2]]  ;;  %s73_s3 = sld [smem:[#allocation3 + $0x3]] }
  0x1a   :  { %s74_s4 = sld [smem:[#allocation3 + $0x4]]  ;;  %s75_s5 = sld [smem:[#allocation3 + $0x5]] }
  0x1b   :  { %s76_s6 = sld [smem:[#allocation3 + $0x6]]  ;;  %s77_s7 = sld [smem:[#allocation3 + $0x7]] }
  0x1c   :  { %s101_s17 = scalar_lea.hbm %s173_s2, 16 }
  0x1d   :  { %p102_p6 = scmp.ne.s32.totalorder %s173_s2, %s101_s17  ;;  %p105_p7 = scmp.lt.u32.totalorder %s101_s17, %s173_s2 }
  0x1e   :  { %s26_s8 = sld [smem:[#allocation4 + %s25_s28]] }
  0x1f   :  { %s30_s9 = sld [smem:[#allocation4 + %s71_s29]]  ;;  %p107_p8 = pnand %p105_p7, %p102_p6 }
  0x20   :  { %s34_s10 = sld [smem:[#allocation4 + %s72_s30]] }
  0x21   :  { %s38_s11 = sld [smem:[#allocation4 + %s73_s3]] }
  0x22   :  { %s42_s12 = sld [smem:[#allocation4 + %s74_s4]] }
  0x23   :  { %s46_s13 = sld [smem:[#allocation4 + %s75_s5]] }
  0x24   :  { %s50_s14 = sld [smem:[#allocation4 + %s76_s6]] }
  0x25   :  { %s54_s15 = sld [smem:[#allocation4 + %s77_s7]] }
  0x26   :  { %28 = sst [smem:[#allocation7]] %s26_s8 }
  0x27   :  { %32 = sst [smem:[#allocation7 + $0x1]] %s30_s9 }
  0x28   :  { %36 = sst [smem:[#allocation7 + $0x2]] %s34_s10 }
  0x29   :  { %40 = sst [smem:[#allocation7 + $0x3]] %s38_s11 }
  0x2a   :  { %44 = sst [smem:[#allocation7 + $0x4]] %s42_s12 }
  0x2b   :  { %48 = sst [smem:[#allocation7 + $0x5]] %s46_s13 }
  0x2c   :  { %52 = sst [smem:[#allocation7 + $0x6]] %s50_s14 }
  0x2d   :  { %56 = sst [smem:[#allocation7 + $0x7]] %s54_s15 }
  0x2e   :  { %110 = shalt.err (!%p107_p8)
}
  0x2f   :  { %s119_s22 = smov [#allocation7]  }
  0x30   :  { %64 = dma.smem_to_hbm %s119_s22, 16, %s173_s2, [#allocation6]  }
  0x31   :  { %115 = dma.done.wait [#allocation6], 16  }
  0x32   :  { %116 = vsyncadd [#allocation6], 4294967280 }
  0x33   :  { %68 = sfence }
  0x34   :  { %69 = vsyncpa [#allocation5], 1 }
  0x35   :  { %70 = vsyncpa [#allocation6], 1 }

</bundles_post_ra>
